<compile_context>
chip_gen: v5e
topology: v5e:2x2
jax: 0.10.0
libtpu: 0.0.40
codegen_flags: <defaults>
</compile_context>

<pallas_src>
import functools

import jax
import jax.numpy as jnp
from jax.experimental import pallas as pl
from jax.experimental.pallas import tpu as pltpu

A_DEFAULT = 1.7159
S_DEFAULT = 2.0 / 3.0

_LANE = 128
_MIN_PALLAS_ELEMS = 64 * 1024            # below this, let XLA fuse the op
_FALLBACK_VMEM_BYTES = 64 * 1024 * 1024  # conservative default (v7x per-TC VMEM)


def _tpu_vmem_bytes():
    """Per-core VMEM capacity; conservative fallback if the query fails."""
    try:
        vmem = int(pltpu.get_tpu_info().vmem_capacity_bytes)
        if vmem > 0:
            return vmem
    except Exception:
        pass
    return _FALLBACK_VMEM_BYTES


def _sublane_multiple(dtype):
    # Rows per packed sublane group: 8 for f32, 16 for bf16, 32 for int8/fp8.
    itemsize = jnp.dtype(dtype).itemsize
    return max(32 // max(itemsize, 1), 8)


def _scaled_tanh_kernel(x_ref, o_ref, *, a, s):
    # Elementwise hot path: mul (VPU), tanh (EUP), mul (VPU). f32 math is free
    # here (HBM-bound), and matches PyTorch's f32-accumulating tanh.
    xf = x_ref[...].astype(jnp.float32)
    o_ref[...] = (a * jnp.tanh(s * xf)).astype(o_ref.dtype)


def _choose_width(n, min_rows):
    """Widest lane-dense last dim (multiple of 128) that divides n."""
    for w in (4096, 2048, 1024, 512, 256, 128):
        if n % w == 0 and n // w >= min_rows:
            return w
    for w in (4096, 2048, 1024, 512, 256, 128):
        if n % w == 0:
            return w
    return _LANE  # unreachable: n is always a multiple of 128 here


def _run_bulk(flat, a, s):
    """Run the Pallas kernel on a flat array whose length is a multiple of 128."""
    n = flat.shape[0]
    dtype = flat.dtype
    itemsize = jnp.dtype(dtype).itemsize
    sub = _sublane_multiple(dtype)

    w = _choose_width(n, sub)
    rows = n // w
    slab = flat.reshape(rows, w)  # free reshape of contiguous data

    vmem = _tpu_vmem_bytes()
    is_small_vmem = vmem <= 64 * 1024 * 1024  # v7x-class
    # ~VMEM/8 per block: 16 MiB on v5e/v6e, 8 MiB on v7x (4 resident buffers).
    target_block_bytes = max(min(vmem // 8, 16 * 1024 * 1024), 1 * 1024 * 1024)

    block_rows = max(target_block_bytes // (w * itemsize), sub)
    br = max((block_rows // sub) * sub, sub)
    if rows <= sub:
        br = rows  # single full-extent block (always legal)
    else:
        # Guarantee >= 2 grid steps so both v7x TensorCores stream.
        half = -(-rows // 2)
        half = -(-half // sub) * sub
        br = max(min(br, half), sub)
    grid = (pl.cdiv(rows, br),)

    # 3-deep input pipeline only on short-step (high-BW, small-VMEM) chips.
    in_buffers = 3 if (is_small_vmem and grid[0] > 2) else 2
    block_bytes = br * w * itemsize
    vmem_limit = int(min(max(block_bytes * (in_buffers + 2 + 1.5),
                             16 * 1024 * 1024),
                         vmem * 3 // 4))

    in_spec = pl.BlockSpec((br, w), lambda i: (i, 0))
    if in_buffers > 2 and hasattr(pl, "Buffered"):
        try:
            in_spec = pl.BlockSpec((br, w), lambda i: (i, 0),
                                   pipeline_mode=pl.Buffered(in_buffers))
        except TypeError:
            in_spec = pl.BlockSpec((br, w), lambda i: (i, 0))

    kernel = functools.partial(_scaled_tanh_kernel, a=a, s=s)
    out = pl.pallas_call(
        kernel,
        out_shape=jax.ShapeDtypeStruct((rows, w), dtype),
        grid=grid,
        in_specs=[in_spec],
        out_specs=pl.BlockSpec((br, w), lambda i: (i, 0)),
        compiler_params=pltpu.CompilerParams(
            dimension_semantics=("parallel",),
            vmem_limit_bytes=vmem_limit,
        ),
    )(slab)
    return out.reshape(-1)


def scaled_hyperbolic_tanh(x, a=A_DEFAULT, s=S_DEFAULT, *,
                           min_pallas_elems=_MIN_PALLAS_ELEMS):
    """Applies y = a * tanh(s * x) elementwise. Same shape & dtype as `x`."""
    orig_shape = x.shape
    orig_dtype = x.dtype
    flat = x.reshape(-1)
    n = flat.shape[0]

    if n < max(min_pallas_elems, _LANE):
        # Small activations: plain jnp so XLA can fuse into the producing op.
        return (a * jnp.tanh(s * x.astype(jnp.float32))).astype(orig_dtype)

    pad = (-n) % _LANE
    if pad:
        # Single pad pass + slice instead of slice + concatenate (which would
        # double HBM traffic on a 100% HBM-bound kernel).
        flat = jnp.pad(flat, (0, pad))
    out_flat = _run_bulk(flat, a, s)
    if pad:
        out_flat = out_flat[:n]
    return out_flat.reshape(orig_shape)


if __name__ == "__main__":
    key = jax.random.PRNGKey(0)
    k1, k2, k3 = jax.random.split(key, 3)

    def ref_fn(x):
        return (A_DEFAULT * jnp.tanh(S_DEFAULT * x.astype(jnp.float32))
                ).astype(x.dtype)

    # 1) LeNet-scale NCHW activation (small -> fusible jnp path).
    x_small = jax.random.normal(k1, (2, 4, 16, 16), dtype=jnp.float32)
    y_small = jax.block_until_ready(scaled_hyperbolic_tanh(x_small))
    assert y_small.shape == x_small.shape and y_small.dtype == x_small.dtype
    assert jnp.allclose(y_small, ref_fn(x_small), atol=1e-6, rtol=1e-6)

    # 2) Larger activation that exercises the Pallas streaming kernel.
    x_big = jax.random.normal(k2, (4, 16, 64, 64), dtype=jnp.float32)
    y_big = jax.block_until_ready(scaled_hyperbolic_tanh(x_big))
    assert y_big.shape == x_big.shape and y_big.dtype == x_big.dtype
    assert jnp.allclose(y_big, ref_fn(x_big), atol=1e-5, rtol=1e-5)

    # 3) Ragged size (not a multiple of 128) through the padded Pallas path.
    x_rag = jax.random.normal(k3, (257, 515), dtype=jnp.float32)
    y_rag = jax.block_until_ready(scaled_hyperbolic_tanh(x_rag))
    assert y_rag.shape == x_rag.shape and y_rag.dtype == x_rag.dtype
    assert jnp.allclose(y_rag, ref_fn(x_rag), atol=1e-5, rtol=1e-5)

    print("KERNEL_OK")
</pallas_src>

<mosaic_0001>
module attributes {stable_mosaic.version = 11 : i64} {
  func.func @_scaled_tanh_kernel(%arg0: i32, %arg1: memref<32x4096xf32, #tpu.memory_space<vmem>>, %arg2: memref<32x4096xf32, #tpu.memory_space<vmem>>) attributes {dimension_semantics = [#tpu.dimension_semantics<parallel>], iteration_bounds = array<i64: 2>, scalar_prefetch = 0 : i64, scratch_operands = 0 : i64, tpu.core_type = #tpu.core_type<tc>, window_params = [{transform_indices = @transform_0, window_bounds = array<i64: 32, 4096>}, {transform_indices = @transform_1, window_bounds = array<i64: 32, 4096>}]} {
    %c0 = arith.constant 0 : index
    %c0_0 = arith.constant 0 : index
    %0 = vector.load %arg1[%c0, %c0_0] : memref<32x4096xf32, #tpu.memory_space<vmem>>, vector<32x4096xf32>
    %cst = arith.constant 0.666666686 : f32
    %1 = vector.broadcast %cst : f32 to vector<32x4096xf32>
    %2 = arith.mulf %1, %0 : vector<32x4096xf32>
    %3 = math.tanh %2 : vector<32x4096xf32>
    %cst_1 = arith.constant 1.715900e+00 : f32
    %4 = vector.broadcast %cst_1 : f32 to vector<32x4096xf32>
    %5 = arith.mulf %4, %3 : vector<32x4096xf32>
    %c0_2 = arith.constant 0 : index
    %c0_3 = arith.constant 0 : index
    %6 = vector.load %arg2[%c0_2, %c0_3] : memref<32x4096xf32, #tpu.memory_space<vmem>>, vector<32x4096xf32>
    tpu.vector_store %arg2[%c0_2, %c0_3], %5 {strides = array<i32>} : memref<32x4096xf32, #tpu.memory_space<vmem>>, vector<32x4096xf32>,
    return
  }
  func.func @transform_0(%arg0: i32) -> (i32, i32) {
    %c0_i32 = arith.constant 0 : i32
    %c0_i32_0 = arith.constant 0 : i32
    return %arg0, %c0_i32 : i32, i32
  }
  func.func @transform_1(%arg0: i32) -> (i32, i32) {
    %c0_i32 = arith.constant 0 : i32
    %c0_i32_0 = arith.constant 0 : i32
    return %arg0, %c0_i32 : i32, i32
  }
}

</mosaic_0001>

<bundles_post_ra>
// kernel: tpu_custom_call.1
= control target key start
LH: loop header
LB: loop body
LE: loop exit
PB: predicated region body
PF: predicated region fallthrough
CT: control target
= control target key end

     0   :  { %6 = vsyncpa [#allocation3], 0  ;;  %s1700_s0 = inlined_call_operand.hbm [shape: f32[64,4096], index: 0, kind: input, shape index: {}]   ;;  %s1701_s1 = inlined_call_operand.hbm [shape: f32[64,4096], index: 1, kind: output, shape index: {}]  }
   0x1   :  { %8 = vsyncpa [#allocation3 + $0x1], 0 }
   0x2   :  { %9 = vsyncpa [#allocation4], 0 }
   0x3   :  { %11 = vsyncpa [#allocation4 + $0x1], 0  ;;  %s1308_s6 = smov 0   ;;  %s1310_s7 = smov 0  }
   0x4   :  { %s1312_s8 = smov 0   ;;  %s1314_s9 = smov 0  }
   0x5 LB: > { %s1329_s10 = sadd.s32 4294967295, %s1292_s9   ;;  %s870_s11 = sadd.s32 4294967294, %s1292_s9   ;;  %s1292_s9 = sphi %s1314_s9, %s1711_s9   ;;  %s1288_s8 = sphi %s1312_s8, %s1710_s8   ;;  %s1284_s7 = sphi %s1310_s7, %s1709_s7   ;;  %s1280_s6 = sphi %s1308_s6, %s1708_s6  }
   0x6   : > { %s1333_s12 = sadd.s32 1, %s1292_s9   ;;  %s24_s13 = sadd.s32 1, %s1288_s8 }
   0x7   : > { %s21_s14 = ssub.s32 %s1292_s9, %s1333_s12  ;;  %p31_p0 = scmp.ne.s32.totalorder %s1288_s8, %s1284_s7 }
   0x8   : > { %p22_p1 = scmp.eq.s32.totalorder %s21_s14, 0  ;;  %p32_p2 = scmp.eq.s32.totalorder %s1292_s9, 0 }
   0x9   : > { %p37_p3 = scmp.ne.s32.totalorder %s1284_s7, %s1280_s6  ;;  %p38_p4 = scmp.eq.s32.totalorder %s1329_s10, 0 }
   0xa   : > { %s1345_s15 = scalar_select %p22_p1, %s1288_s8, %s24_s13  }
   0xb   : > { %p1347_p5 = por %p32_p2, %p31_p0  ;;  %p1351_p6 = por %p38_p4, %p37_p3 }
   0xc   : > { %p61_p7 = scmp.eq.s32.totalorder %s1329_s10, 1  ;;  %p67_p8 = scmp.eq.s32.totalorder %s870_s11, 1 }
   0xd   : > { %p902_p10 = scmp.lt.s32.totalorder %s1292_s9, 2  ;;  %s87_s20 = sand.u32 1, %s1288_s8  }
   0xe   : > { %p1358_p11 = por %p61_p7, %p31_p0  ;;  %p1362_p12 = por %p67_p8, %p37_p3 }
   0xf   : > { %s887_s21 = sshll.u32 %s1292_s9, 10  ;;  %s873_s22 = sshll.u32 %s87_s20, 10 }
  0x10   : > { %s97_s25 = scalar_lea.hbm %s1700_s0, %s887_s21  ;;  %s91_s27 = scalar_lea.vmem [#allocation2], %s873_s22 }
  0x11   : > { %s98_s26 = sshll.u32 %s97_s25, 4  ;;  %s100_s28 = sshll.u32 %s91_s27, 4  ;;  %s99_s26 = int_to_ptr.hbm [resolvable:$true] %s98_s26  ;;  %s101_s28 = int_to_ptr.vmem [resolvable:$true] %s100_s28 }
  0x12   : > { %p1373_p13 = pnand %p902_p10, %p1347_p5  ;;  %p877_p0 = scmp.ge.s32.totalorder %s1292_s9, 1 }
  0x13   : > { %p108_p1 = scmp.lt.s32.totalorder %s1292_s9, 3  ;;  %s88_s30 = scalar_lea.sflag [#allocation3], %s87_s20 }
  0x14   : > { %s1196_s2 = sshra.s32 %s99_s26, 4  ;;  %p1200_p3 = pneg %p1373_p13  ;;  %s1197_s2 = int_to_ptr.hbm [resolvable:$true] %s1196_s2 }
  0x15   : > { %s1198_s3 = scalar_lea.hbm %s1197_s2, 1024  ;;  %s1203_s11 = scalar_lea.hbm %s1700_s0, 2048 }
  0x16   : > { %p1199_p2 = scmp.ne.s32.totalorder %s1197_s2, %s1198_s3  ;;  %p1204_p5 = scmp.lt.s32.totalorder %s1197_s2, %s1700_s0 }
  0x17   : > { %p1205_p8 = scmp.lt.s32.totalorder %s1203_s11, %s1198_s3 }
  0x18   : > { %p1201_p4 = pnand %p1200_p3, %p1199_p2 }
  0x19   : > { %p1206_p10 = por %p1205_p8, %p1204_p5 }
  0x1a   : > { %p1202_p7 = pneg %p1201_p4 }
  0x1c   : > { %p1207_p9 = pnand %p1206_p10, %p1202_p7 }
  0x1e   : > { %1210 = shalt.err (!%p1207_p9)
}
  0x1f   : > { %s1294_s16 = smov 4096   ;;  %s1295_s20 = smov 256  }
  0x20   : > { %897 = dma.hbm_to_vmem [thread:$0]  (!%p1373_p13), %s99_s26, 16384, %s101_s28, %s88_s30, %s1294_s16, %s1294_s16, %s1295_s20  }
  0x21   : > { %p109_p2 = pnand %p877_p0, %p108_p1 }
  0x22   : > { %s1394_s21 = sand.u32 (!%p109_p2), 1, %s1284_s7  }
  0x23   : > { %112 = sbr.rel (%p109_p2) target bundleno = 184 (0xb8), region = 24  ;;  %s878_s22 = sshll.u32 (!%p109_p2), %s1394_s21, 10 }
  0x24   : > { %s115_s23 = scalar_lea.sflag (!%p109_p2), [#allocation3], %s1394_s21  ;;  %s1400_s24 = scalar_lea.vmem (!%p109_p2), [#allocation2], %s878_s22 }
  0x28   : > { %1271 = dma.done.wait (%p1351_p6), %s115_s23, 16384  }
  0x29   : > { %1273 = vsyncadd (%p1351_p6), %s115_s23, 4294950912  ;;  %v140_v0 = vld [vmem:[%s1400_s24] sm:$0xff]  ;;  %v141_v1 = vld [vmem:[%s1400_s24 + $0x8] sm:$0xff]  ;;  %s1424_s17 = scalar_lea.vmem [#allocation5], %s878_s22  ;;  %s889_s25 = sshll.u32 %s1329_s10, 10 }
  0x2a   : > { %v142_v2 = vld [vmem:[%s1400_s24 + $0x10] sm:$0xff]  ;;  %v268_v3 = vmul.f32 0.6666667, %v140_v0  ;;  %v269_v4 = vmul.f32 0.6666667, %v141_v1  ;;  %v143_v6 = vld [vmem:[%s1400_s24 + $0x18] sm:$0xff]  ;;  %s793_s10 = scalar_lea.hbm %s1701_s1, %s889_s25 }
  0x2b   : > { %v270_v5 = vmul.f32 0.6666667, %v142_v2  ;;  %v144_v7 = vld [vmem:[%s1400_s24 + $0x20] sm:$0xff]  ;;  %v145_v8 = vld [vmem:[%s1400_s24 + $0x28] sm:$0xff]  ;;  %v271_v9 = vmul.f32 0.6666667, %v143_v6 }
  0x2c   : > { %940 = vtanh.f32 %v268_v3  ;;  %v272_v10 = vmul.f32 0.6666667, %v144_v7  ;;  %v273_v11 = vmul.f32 0.6666667, %v145_v8  ;;  %v146_v12 = vld [vmem:[%s1400_s24 + $0x30] sm:$0xff]  ;;  %v147_v13 = vld [vmem:[%s1400_s24 + $0x38] sm:$0xff] }
  0x2d   : > { %942 = vtanh.f32 %v269_v4  ;;  %v148_v14 = vld [vmem:[%s1400_s24 + $0x40] sm:$0xff]  ;;  %v274_v15 = vmul.f32 0.6666667, %v146_v12  ;;  %v275_v16 = vmul.f32 0.6666667, %v147_v13  ;;  %v149_v17 = vld [vmem:[%s1400_s24 + $0x48] sm:$0xff] }
  0x2e   : > { %944 = vtanh.f32 %v270_v5  ;;  %v150_v18 = vld [vmem:[%s1400_s24 + $0x50] sm:$0xff]  ;;  %v276_v19 = vmul.f32 0.6666667, %v148_v14  ;;  %v151_v20 = vld [vmem:[%s1400_s24 + $0x58] sm:$0xff]  ;;  %v277_v21 = vmul.f32 0.6666667, %v149_v17 }
  0x2f   : > { %946 = vtanh.f32 %v271_v9  ;;  %v152_v22 = vld [vmem:[%s1400_s24 + $0x60] sm:$0xff]  ;;  %v278_v24 = vmul.f32 0.6666667, %v150_v18  ;;  %v153_v25 = vld [vmem:[%s1400_s24 + $0x68] sm:$0xff]  ;;  %v279_v28 = vmul.f32 0.6666667, %v151_v20 }
  0x30   : > { %948 = vtanh.f32 %v272_v10  ;;  %v154_v29 = vld [vmem:[%s1400_s24 + $0x70] sm:$0xff]  ;;  %v280_v32 = vmul.f32 0.6666667, %v152_v22  ;;  %v155_v33 = vld [vmem:[%s1400_s24 + $0x78] sm:$0xff]  ;;  %v281_v36 = vmul.f32 0.6666667, %v153_v25 }
  0x31   : > { %950 = vtanh.f32 %v273_v11  ;;  %v156_v37 = vld [vmem:[%s1400_s24 + $0x80] sm:$0xff]  ;;  %v282_v40 = vmul.f32 0.6666667, %v154_v29  ;;  %v157_v41 = vld [vmem:[%s1400_s24 + $0x88] sm:$0xff]  ;;  %v283_v44 = vmul.f32 0.6666667, %v155_v33 }
  0x32   : > { %v941_v23 = vpop.eup %940  ;;  %952 = vtanh.f32 %v274_v15  ;;  %v158_v45 = vld [vmem:[%s1400_s24 + $0x90] sm:$0xff]  ;;  %v284_v48 = vmul.f32 0.6666667, %v156_v37  ;;  %v159_v49 = vld [vmem:[%s1400_s24 + $0x98] sm:$0xff]  ;;  %v285_v52 = vmul.f32 0.6666667, %v157_v41 }
  0x33   : > { %v943_v26 = vpop.eup %942  ;;  %v524_v27 = vmul.f32 1.7159, %v941_v23  ;;  %954 = vtanh.f32 %v275_v16  ;;  %v160_v53 = vld [vmem:[%s1400_s24 + $0xa0] sm:$0xff]  ;;  %v286_v56 = vmul.f32 0.6666667, %v158_v45  ;;  %v161_v57 = vld [vmem:[%s1400_s24 + $0xa8] sm:$0xff] }
  0x34   : > { %v945_v30 = vpop.eup %944  ;;  %v525_v31 = vmul.f32 1.7159, %v943_v26  ;;  %956 = vtanh.f32 %v276_v19  ;;  %v287_v60 = vmul.f32 0.6666667, %v159_v49  ;;  %v162_v61 = vld [vmem:[%s1400_s24 + $0xb0] sm:$0xff]  ;;  %v163_v1 = vld [vmem:[%s1400_s24 + $0xb8] sm:$0xff] }
  0x35   : > { %v947_v34 = vpop.eup %946  ;;  %652 = vst [vmem:[%s1424_s17] sm:$0xff] %v524_v27  ;;  %v526_v35 = vmul.f32 1.7159, %v945_v30  ;;  %958 = vtanh.f32 %v277_v21  ;;  %v288_v0 = vmul.f32 0.6666667, %v160_v53  ;;  %v289_v4 = vmul.f32 0.6666667, %v161_v57 }
  0x36   : > { %v949_v38 = vpop.eup %948  ;;  %653 = vst [vmem:[%s1424_s17 + $0x8] sm:$0xff] %v525_v31  ;;  %v527_v39 = vmul.f32 1.7159, %v947_v34  ;;  %960 = vtanh.f32 %v278_v24  ;;  %v164_v5 = vld [vmem:[%s1400_s24 + $0xc0] sm:$0xff]  ;;  %v290_v8 = vmul.f32 0.6666667, %v162_v61 }
  0x37   : > { %v951_v42 = vpop.eup %950  ;;  %654 = vst [vmem:[%s1424_s17 + $0x10] sm:$0xff] %v526_v35  ;;  %v528_v43 = vmul.f32 1.7159, %v949_v38  ;;  %962 = vtanh.f32 %v279_v28  ;;  %v165_v9 = vld [vmem:[%s1400_s24 + $0xc8] sm:$0xff]  ;;  %v291_v12 = vmul.f32 0.6666667, %v163_v1 }
  0x38   : > { %v953_v46 = vpop.eup %952  ;;  %655 = vst [vmem:[%s1424_s17 + $0x18] sm:$0xff] %v527_v39  ;;  %v529_v47 = vmul.f32 1.7159, %v951_v42  ;;  %964 = vtanh.f32 %v280_v32  ;;  %v166_v13 = vld [vmem:[%s1400_s24 + $0xd0] sm:$0xff]  ;;  %v292_v16 = vmul.f32 0.6666667, %v164_v5 }
  0x39   : > { %v955_v50 = vpop.eup %954  ;;  %656 = vst [vmem:[%s1424_s17 + $0x20] sm:$0xff] %v528_v43  ;;  %v530_v51 = vmul.f32 1.7159, %v953_v46  ;;  %966 = vtanh.f32 %v281_v36  ;;  %v167_v17 = vld [vmem:[%s1400_s24 + $0xd8] sm:$0xff]  ;;  %v293_v20 = vmul.f32 0.6666667, %v165_v9 }
  0x3a   : > { %v957_v54 = vpop.eup %956  ;;  %657 = vst [vmem:[%s1424_s17 + $0x28] sm:$0xff] %v529_v47  ;;  %v531_v55 = vmul.f32 1.7159, %v955_v50  ;;  %968 = vtanh.f32 %v282_v40  ;;  %v168_v21 = vld [vmem:[%s1400_s24 + $0xe0] sm:$0xff]  ;;  %v294_v24 = vmul.f32 0.6666667, %v166_v13 }
  0x3b   : > { %v959_v58 = vpop.eup %958  ;;  %658 = vst [vmem:[%s1424_s17 + $0x30] sm:$0xff] %v530_v51  ;;  %v532_v59 = vmul.f32 1.7159, %v957_v54  ;;  %970 = vtanh.f32 %v283_v44  ;;  %v169_v25 = vld [vmem:[%s1400_s24 + $0xe8] sm:$0xff]  ;;  %v295_v28 = vmul.f32 0.6666667, %v167_v17 }
  0x3c   : > { %v961_v62 = vpop.eup %960  ;;  %659 = vst [vmem:[%s1424_s17 + $0x38] sm:$0xff] %v531_v55  ;;  %v533_v63 = vmul.f32 1.7159, %v959_v58  ;;  %972 = vtanh.f32 %v284_v48  ;;  %v170_v29 = vld [vmem:[%s1400_s24 + $0xf0] sm:$0xff]  ;;  %v296_v32 = vmul.f32 0.6666667, %v168_v21 }
  0x3d   : > { %v963_v2 = vpop.eup %962  ;;  %660 = vst [vmem:[%s1424_s17 + $0x40] sm:$0xff] %v532_v59  ;;  %v534_v3 = vmul.f32 1.7159, %v961_v62  ;;  %974 = vtanh.f32 %v285_v52  ;;  %v171_v33 = vld [vmem:[%s1400_s24 + $0xf8] sm:$0xff]  ;;  %v297_v36 = vmul.f32 0.6666667, %v169_v25 }
  0x3e   : > { %v965_v6 = vpop.eup %964  ;;  %661 = vst [vmem:[%s1424_s17 + $0x48] sm:$0xff] %v533_v63  ;;  %v535_v7 = vmul.f32 1.7159, %v963_v2  ;;  %976 = vtanh.f32 %v286_v56  ;;  %v172_v37 = vld [vmem:[%s1400_s24 + $0x100] sm:$0xff]  ;;  %v298_v40 = vmul.f32 0.6666667, %v170_v29 }
  0x3f   : > { %v967_v10 = vpop.eup %966  ;;  %662 = vst [vmem:[%s1424_s17 + $0x50] sm:$0xff] %v534_v3  ;;  %v536_v11 = vmul.f32 1.7159, %v965_v6  ;;  %978 = vtanh.f32 %v287_v60  ;;  %v173_v41 = vld [vmem:[%s1400_s24 + $0x108] sm:$0xff]  ;;  %v299_v44 = vmul.f32 0.6666667, %v171_v33 }
  0x40   : > { %v969_v14 = vpop.eup %968  ;;  %663 = vst [vmem:[%s1424_s17 + $0x58] sm:$0xff] %v535_v7  ;;  %v537_v15 = vmul.f32 1.7159, %v967_v10  ;;  %980 = vtanh.f32 %v288_v0  ;;  %v174_v45 = vld [vmem:[%s1400_s24 + $0x110] sm:$0xff]  ;;  %v300_v48 = vmul.f32 0.6666667, %v172_v37 }
  0x41   : > { %v971_v18 = vpop.eup %970  ;;  %664 = vst [vmem:[%s1424_s17 + $0x60] sm:$0xff] %v536_v11  ;;  %v538_v19 = vmul.f32 1.7159, %v969_v14  ;;  %982 = vtanh.f32 %v289_v4  ;;  %v175_v49 = vld [vmem:[%s1400_s24 + $0x118] sm:$0xff]  ;;  %v301_v52 = vmul.f32 0.6666667, %v173_v41 }
  0x42   : > { %v973_v22 = vpop.eup %972  ;;  %665 = vst [vmem:[%s1424_s17 + $0x68] sm:$0xff] %v537_v15  ;;  %v539_v23 = vmul.f32 1.7159, %v971_v18  ;;  %984 = vtanh.f32 %v290_v8  ;;  %v176_v53 = vld [vmem:[%s1400_s24 + $0x120] sm:$0xff]  ;;  %v302_v56 = vmul.f32 0.6666667, %v174_v45 }
  0x43   : > { %v975_v26 = vpop.eup %974  ;;  %666 = vst [vmem:[%s1424_s17 + $0x70] sm:$0xff] %v538_v19  ;;  %v540_v27 = vmul.f32 1.7159, %v973_v22  ;;  %986 = vtanh.f32 %v291_v12  ;;  %v177_v57 = vld [vmem:[%s1400_s24 + $0x128] sm:$0xff]  ;;  %v303_v60 = vmul.f32 0.6666667, %v175_v49 }
  0x44   : > { %v977_v30 = vpop.eup %976  ;;  %667 = vst [vmem:[%s1424_s17 + $0x78] sm:$0xff] %v539_v23  ;;  %v541_v31 = vmul.f32 1.7159, %v975_v26  ;;  %988 = vtanh.f32 %v292_v16  ;;  %v178_v61 = vld [vmem:[%s1400_s24 + $0x130] sm:$0xff]  ;;  %v304_v0 = vmul.f32 0.6666667, %v176_v53 }
  0x45   : > { %v979_v34 = vpop.eup %978  ;;  %668 = vst [vmem:[%s1424_s17 + $0x80] sm:$0xff] %v540_v27  ;;  %v542_v35 = vmul.f32 1.7159, %v977_v30  ;;  %990 = vtanh.f32 %v293_v20  ;;  %v179_v1 = vld [vmem:[%s1400_s24 + $0x138] sm:$0xff]  ;;  %v305_v4 = vmul.f32 0.6666667, %v177_v57 }
  0x46   : > { %v981_v38 = vpop.eup %980  ;;  %669 = vst [vmem:[%s1424_s17 + $0x88] sm:$0xff] %v541_v31  ;;  %v543_v39 = vmul.f32 1.7159, %v979_v34  ;;  %992 = vtanh.f32 %v294_v24  ;;  %v180_v5 = vld [vmem:[%s1400_s24 + $0x140] sm:$0xff]  ;;  %v306_v8 = vmul.f32 0.6666667, %v178_v61 }
  0x47   : > { %v983_v42 = vpop.eup %982  ;;  %670 = vst [vmem:[%s1424_s17 + $0x90] sm:$0xff] %v542_v35  ;;  %v544_v43 = vmul.f32 1.7159, %v981_v38  ;;  %994 = vtanh.f32 %v295_v28  ;;  %v181_v9 = vld [vmem:[%s1400_s24 + $0x148] sm:$0xff]  ;;  %v307_v12 = vmul.f32 0.6666667, %v179_v1 }
  0x48   : > { %v985_v46 = vpop.eup %984  ;;  %671 = vst [vmem:[%s1424_s17 + $0x98] sm:$0xff] %v543_v39  ;;  %v545_v47 = vmul.f32 1.7159, %v983_v42  ;;  %996 = vtanh.f32 %v296_v32  ;;  %v182_v13 = vld [vmem:[%s1400_s24 + $0x150] sm:$0xff]  ;;  %v308_v16 = vmul.f32 0.6666667, %v180_v5 }
  0x49   : > { %v987_v50 = vpop.eup %986  ;;  %672 = vst [vmem:[%s1424_s17 + $0xa0] sm:$0xff] %v544_v43  ;;  %v546_v51 = vmul.f32 1.7159, %v985_v46  ;;  %998 = vtanh.f32 %v297_v36  ;;  %v183_v17 = vld [vmem:[%s1400_s24 + $0x158] sm:$0xff]  ;;  %v309_v20 = vmul.f32 0.6666667, %v181_v9 }
  0x4a   : > { %v989_v54 = vpop.eup %988  ;;  %673 = vst [vmem:[%s1424_s17 + $0xa8] sm:$0xff] %v545_v47  ;;  %v547_v55 = vmul.f32 1.7159, %v987_v50  ;;  %1000 = vtanh.f32 %v298_v40  ;;  %v184_v21 = vld [vmem:[%s1400_s24 + $0x160] sm:$0xff]  ;;  %v310_v24 = vmul.f32 0.6666667, %v182_v13 }
  0x4b   : > { %v991_v58 = vpop.eup %990  ;;  %674 = vst [vmem:[%s1424_s17 + $0xb0] sm:$0xff] %v546_v51  ;;  %v548_v59 = vmul.f32 1.7159, %v989_v54  ;;  %1002 = vtanh.f32 %v299_v44  ;;  %v185_v25 = vld [vmem:[%s1400_s24 + $0x168] sm:$0xff]  ;;  %v311_v28 = vmul.f32 0.6666667, %v183_v17 }
  0x4c   : > { %v993_v62 = vpop.eup %992  ;;  %675 = vst [vmem:[%s1424_s17 + $0xb8] sm:$0xff] %v547_v55  ;;  %v549_v63 = vmul.f32 1.7159, %v991_v58  ;;  %1004 = vtanh.f32 %v300_v48  ;;  %v186_v29 = vld [vmem:[%s1400_s24 + $0x170] sm:$0xff]  ;;  %v312_v32 = vmul.f32 0.6666667, %v184_v21 }
  0x4d   : > { %v995_v2 = vpop.eup %994  ;;  %676 = vst [vmem:[%s1424_s17 + $0xc0] sm:$0xff] %v548_v59  ;;  %v550_v3 = vmul.f32 1.7159, %v993_v62  ;;  %1006 = vtanh.f32 %v301_v52  ;;  %v187_v33 = vld [vmem:[%s1400_s24 + $0x178] sm:$0xff]  ;;  %v313_v36 = vmul.f32 0.6666667, %v185_v25 }
  0x4e   : > { %v997_v6 = vpop.eup %996  ;;  %677 = vst [vmem:[%s1424_s17 + $0xc8] sm:$0xff] %v549_v63  ;;  %v551_v7 = vmul.f32 1.7159, %v995_v2  ;;  %1008 = vtanh.f32 %v302_v56  ;;  %v188_v37 = vld [vmem:[%s1400_s24 + $0x180] sm:$0xff]  ;;  %v314_v40 = vmul.f32 0.6666667, %v186_v29 }
  0x4f   : > { %v999_v10 = vpop.eup %998  ;;  %678 = vst [vmem:[%s1424_s17 + $0xd0] sm:$0xff] %v550_v3  ;;  %v552_v11 = vmul.f32 1.7159, %v997_v6  ;;  %1010 = vtanh.f32 %v303_v60  ;;  %v189_v41 = vld [vmem:[%s1400_s24 + $0x188] sm:$0xff]  ;;  %v315_v44 = vmul.f32 0.6666667, %v187_v33 }
  0x50   : > { %v1001_v14 = vpop.eup %1000  ;;  %679 = vst [vmem:[%s1424_s17 + $0xd8] sm:$0xff] %v551_v7  ;;  %v553_v15 = vmul.f32 1.7159, %v999_v10  ;;  %1012 = vtanh.f32 %v304_v0  ;;  %v190_v45 = vld [vmem:[%s1400_s24 + $0x190] sm:$0xff]  ;;  %v316_v48 = vmul.f32 0.6666667, %v188_v37 }
  0x51   : > { %v1003_v18 = vpop.eup %1002  ;;  %680 = vst [vmem:[%s1424_s17 + $0xe0] sm:$0xff] %v552_v11  ;;  %v554_v19 = vmul.f32 1.7159, %v1001_v14  ;;  %1014 = vtanh.f32 %v305_v4  ;;  %v191_v49 = vld [vmem:[%s1400_s24 + $0x198] sm:$0xff]  ;;  %v317_v52 = vmul.f32 0.6666667, %v189_v41 }
  0x52   : > { %v1005_v22 = vpop.eup %1004  ;;  %681 = vst [vmem:[%s1424_s17 + $0xe8] sm:$0xff] %v553_v15  ;;  %v555_v23 = vmul.f32 1.7159, %v1003_v18  ;;  %1016 = vtanh.f32 %v306_v8  ;;  %v192_v53 = vld [vmem:[%s1400_s24 + $0x1a0] sm:$0xff]  ;;  %v318_v56 = vmul.f32 0.6666667, %v190_v45 }
  0x53   : > { %v1007_v26 = vpop.eup %1006  ;;  %682 = vst [vmem:[%s1424_s17 + $0xf0] sm:$0xff] %v554_v19  ;;  %v556_v27 = vmul.f32 1.7159, %v1005_v22  ;;  %1018 = vtanh.f32 %v307_v12  ;;  %v193_v57 = vld [vmem:[%s1400_s24 + $0x1a8] sm:$0xff]  ;;  %v319_v60 = vmul.f32 0.6666667, %v191_v49 }
  0x54   : > { %v1009_v30 = vpop.eup %1008  ;;  %683 = vst [vmem:[%s1424_s17 + $0xf8] sm:$0xff] %v555_v23  ;;  %v557_v31 = vmul.f32 1.7159, %v1007_v26  ;;  %1020 = vtanh.f32 %v308_v16  ;;  %v194_v61 = vld [vmem:[%s1400_s24 + $0x1b0] sm:$0xff]  ;;  %v320_v0 = vmul.f32 0.6666667, %v192_v53 }
  0x55   : > { %v1011_v34 = vpop.eup %1010  ;;  %684 = vst [vmem:[%s1424_s17 + $0x100] sm:$0xff] %v556_v27  ;;  %v558_v35 = vmul.f32 1.7159, %v1009_v30  ;;  %1022 = vtanh.f32 %v309_v20  ;;  %v195_v1 = vld [vmem:[%s1400_s24 + $0x1b8] sm:$0xff]  ;;  %v321_v4 = vmul.f32 0.6666667, %v193_v57 }
  0x56   : > { %v1013_v38 = vpop.eup %1012  ;;  %685 = vst [vmem:[%s1424_s17 + $0x108] sm:$0xff] %v557_v31  ;;  %v559_v39 = vmul.f32 1.7159, %v1011_v34  ;;  %1024 = vtanh.f32 %v310_v24  ;;  %v196_v5 = vld [vmem:[%s1400_s24 + $0x1c0] sm:$0xff]  ;;  %v322_v8 = vmul.f32 0.6666667, %v194_v61 }
  0x57   : > { %v1015_v42 = vpop.eup %1014  ;;  %686 = vst [vmem:[%s1424_s17 + $0x110] sm:$0xff] %v558_v35  ;;  %v560_v43 = vmul.f32 1.7159, %v1013_v38  ;;  %1026 = vtanh.f32 %v311_v28  ;;  %v197_v9 = vld [vmem:[%s1400_s24 + $0x1c8] sm:$0xff]  ;;  %v323_v12 = vmul.f32 0.6666667, %v195_v1 }
  0x58   : > { %v1017_v46 = vpop.eup %1016  ;;  %687 = vst [vmem:[%s1424_s17 + $0x118] sm:$0xff] %v559_v39  ;;  %v561_v47 = vmul.f32 1.7159, %v1015_v42  ;;  %1028 = vtanh.f32 %v312_v32  ;;  %v198_v13 = vld [vmem:[%s1400_s24 + $0x1d0] sm:$0xff]  ;;  %v324_v16 = vmul.f32 0.6666667, %v196_v5 }
  0x59   : > { %v1019_v50 = vpop.eup %1018  ;;  %688 = vst [vmem:[%s1424_s17 + $0x120] sm:$0xff] %v560_v43  ;;  %v562_v51 = vmul.f32 1.7159, %v1017_v46  ;;  %1030 = vtanh.f32 %v313_v36  ;;  %v199_v17 = vld [vmem:[%s1400_s24 + $0x1d8] sm:$0xff]  ;;  %v325_v20 = vmul.f32 0.6666667, %v197_v9 }
  0x5a   : > { %v1021_v54 = vpop.eup %1020  ;;  %689 = vst [vmem:[%s1424_s17 + $0x128] sm:$0xff] %v561_v47  ;;  %v563_v55 = vmul.f32 1.7159, %v1019_v50  ;;  %1032 = vtanh.f32 %v314_v40  ;;  %v200_v21 = vld [vmem:[%s1400_s24 + $0x1e0] sm:$0xff]  ;;  %v326_v24 = vmul.f32 0.6666667, %v198_v13 }
  0x5b   : > { %v1023_v58 = vpop.eup %1022  ;;  %690 = vst [vmem:[%s1424_s17 + $0x130] sm:$0xff] %v562_v51  ;;  %v564_v59 = vmul.f32 1.7159, %v1021_v54  ;;  %1034 = vtanh.f32 %v315_v44  ;;  %v201_v25 = vld [vmem:[%s1400_s24 + $0x1e8] sm:$0xff]  ;;  %v327_v28 = vmul.f32 0.6666667, %v199_v17 }
  0x5c   : > { %v1025_v62 = vpop.eup %1024  ;;  %691 = vst [vmem:[%s1424_s17 + $0x138] sm:$0xff] %v563_v55  ;;  %v565_v63 = vmul.f32 1.7159, %v1023_v58  ;;  %1036 = vtanh.f32 %v316_v48  ;;  %v202_v29 = vld [vmem:[%s1400_s24 + $0x1f0] sm:$0xff]  ;;  %v328_v32 = vmul.f32 0.6666667, %v200_v21 }
  0x5d   : > { %v1027_v2 = vpop.eup %1026  ;;  %692 = vst [vmem:[%s1424_s17 + $0x140] sm:$0xff] %v564_v59  ;;  %v566_v3 = vmul.f32 1.7159, %v1025_v62  ;;  %1038 = vtanh.f32 %v317_v52  ;;  %v203_v33 = vld [vmem:[%s1400_s24 + $0x1f8] sm:$0xff]  ;;  %v329_v36 = vmul.f32 0.6666667, %v201_v25 }
  0x5e   : > { %v1029_v6 = vpop.eup %1028  ;;  %693 = vst [vmem:[%s1424_s17 + $0x148] sm:$0xff] %v565_v63  ;;  %v567_v7 = vmul.f32 1.7159, %v1027_v2  ;;  %1040 = vtanh.f32 %v318_v56  ;;  %v204_v37 = vld [vmem:[%s1400_s24 + $0x200] sm:$0xff]  ;;  %v330_v40 = vmul.f32 0.6666667, %v202_v29 }
  0x5f   : > { %v1031_v10 = vpop.eup %1030  ;;  %694 = vst [vmem:[%s1424_s17 + $0x150] sm:$0xff] %v566_v3  ;;  %v568_v11 = vmul.f32 1.7159, %v1029_v6  ;;  %1042 = vtanh.f32 %v319_v60  ;;  %v205_v41 = vld [vmem:[%s1400_s24 + $0x208] sm:$0xff]  ;;  %v331_v44 = vmul.f32 0.6666667, %v203_v33 }
  0x60   : > { %v1033_v14 = vpop.eup %1032  ;;  %695 = vst [vmem:[%s1424_s17 + $0x158] sm:$0xff] %v567_v7  ;;  %v569_v15 = vmul.f32 1.7159, %v1031_v10  ;;  %1044 = vtanh.f32 %v320_v0  ;;  %v206_v45 = vld [vmem:[%s1400_s24 + $0x210] sm:$0xff]  ;;  %v332_v48 = vmul.f32 0.6666667, %v204_v37 }
  0x61   : > { %v1035_v18 = vpop.eup %1034  ;;  %696 = vst [vmem:[%s1424_s17 + $0x160] sm:$0xff] %v568_v11  ;;  %v570_v19 = vmul.f32 1.7159, %v1033_v14  ;;  %1046 = vtanh.f32 %v321_v4  ;;  %v207_v49 = vld [vmem:[%s1400_s24 + $0x218] sm:$0xff]  ;;  %v333_v52 = vmul.f32 0.6666667, %v205_v41 }
  0x62   : > { %v1037_v22 = vpop.eup %1036  ;;  %697 = vst [vmem:[%s1424_s17 + $0x168] sm:$0xff] %v569_v15  ;;  %v571_v23 = vmul.f32 1.7159, %v1035_v18  ;;  %1048 = vtanh.f32 %v322_v8  ;;  %v208_v53 = vld [vmem:[%s1400_s24 + $0x220] sm:$0xff]  ;;  %v334_v56 = vmul.f32 0.6666667, %v206_v45 }
  0x63   : > { %v1039_v26 = vpop.eup %1038  ;;  %698 = vst [vmem:[%s1424_s17 + $0x170] sm:$0xff] %v570_v19  ;;  %v572_v27 = vmul.f32 1.7159, %v1037_v22  ;;  %1050 = vtanh.f32 %v323_v12  ;;  %v209_v57 = vld [vmem:[%s1400_s24 + $0x228] sm:$0xff]  ;;  %v335_v60 = vmul.f32 0.6666667, %v207_v49 }
  0x64   : > { %v1041_v30 = vpop.eup %1040  ;;  %699 = vst [vmem:[%s1424_s17 + $0x178] sm:$0xff] %v571_v23  ;;  %v573_v31 = vmul.f32 1.7159, %v1039_v26  ;;  %1052 = vtanh.f32 %v324_v16  ;;  %v210_v61 = vld [vmem:[%s1400_s24 + $0x230] sm:$0xff]  ;;  %v336_v0 = vmul.f32 0.6666667, %v208_v53 }
  0x65   : > { %v1043_v34 = vpop.eup %1042  ;;  %700 = vst [vmem:[%s1424_s17 + $0x180] sm:$0xff] %v572_v27  ;;  %v574_v35 = vmul.f32 1.7159, %v1041_v30  ;;  %1054 = vtanh.f32 %v325_v20  ;;  %v211_v1 = vld [vmem:[%s1400_s24 + $0x238] sm:$0xff]  ;;  %v337_v4 = vmul.f32 0.6666667, %v209_v57 }
  0x66   : > { %v1045_v38 = vpop.eup %1044  ;;  %701 = vst [vmem:[%s1424_s17 + $0x188] sm:$0xff] %v573_v31  ;;  %v575_v39 = vmul.f32 1.7159, %v1043_v34  ;;  %1056 = vtanh.f32 %v326_v24  ;;  %v212_v5 = vld [vmem:[%s1400_s24 + $0x240] sm:$0xff]  ;;  %v338_v8 = vmul.f32 0.6666667, %v210_v61 }
  0x67   : > { %v1047_v42 = vpop.eup %1046  ;;  %702 = vst [vmem:[%s1424_s17 + $0x190] sm:$0xff] %v574_v35  ;;  %v576_v43 = vmul.f32 1.7159, %v1045_v38  ;;  %1058 = vtanh.f32 %v327_v28  ;;  %v213_v9 = vld [vmem:[%s1400_s24 + $0x248] sm:$0xff]  ;;  %v339_v12 = vmul.f32 0.6666667, %v211_v1 }
  0x68   : > { %v1049_v46 = vpop.eup %1048  ;;  %703 = vst [vmem:[%s1424_s17 + $0x198] sm:$0xff] %v575_v39  ;;  %v577_v47 = vmul.f32 1.7159, %v1047_v42  ;;  %1060 = vtanh.f32 %v328_v32  ;;  %v214_v13 = vld [vmem:[%s1400_s24 + $0x250] sm:$0xff]  ;;  %v340_v16 = vmul.f32 0.6666667, %v212_v5 }
  0x69   : > { %v1051_v50 = vpop.eup %1050  ;;  %704 = vst [vmem:[%s1424_s17 + $0x1a0] sm:$0xff] %v576_v43  ;;  %v578_v51 = vmul.f32 1.7159, %v1049_v46  ;;  %1062 = vtanh.f32 %v329_v36  ;;  %v215_v17 = vld [vmem:[%s1400_s24 + $0x258] sm:$0xff]  ;;  %v341_v20 = vmul.f32 0.6666667, %v213_v9 }
  0x6a   : > { %v1053_v54 = vpop.eup %1052  ;;  %705 = vst [vmem:[%s1424_s17 + $0x1a8] sm:$0xff] %v577_v47  ;;  %v579_v55 = vmul.f32 1.7159, %v1051_v50  ;;  %1064 = vtanh.f32 %v330_v40  ;;  %v216_v21 = vld [vmem:[%s1400_s24 + $0x260] sm:$0xff]  ;;  %v342_v24 = vmul.f32 0.6666667, %v214_v13 }
  0x6b   : > { %v1055_v58 = vpop.eup %1054  ;;  %706 = vst [vmem:[%s1424_s17 + $0x1b0] sm:$0xff] %v578_v51  ;;  %v580_v59 = vmul.f32 1.7159, %v1053_v54  ;;  %1066 = vtanh.f32 %v331_v44  ;;  %v217_v25 = vld [vmem:[%s1400_s24 + $0x268] sm:$0xff]  ;;  %v343_v28 = vmul.f32 0.6666667, %v215_v17 }
  0x6c   : > { %v1057_v62 = vpop.eup %1056  ;;  %707 = vst [vmem:[%s1424_s17 + $0x1b8] sm:$0xff] %v579_v55  ;;  %v581_v63 = vmul.f32 1.7159, %v1055_v58  ;;  %1068 = vtanh.f32 %v332_v48  ;;  %v218_v29 = vld [vmem:[%s1400_s24 + $0x270] sm:$0xff]  ;;  %v344_v32 = vmul.f32 0.6666667, %v216_v21 }
  0x6d   : > { %v1059_v2 = vpop.eup %1058  ;;  %708 = vst [vmem:[%s1424_s17 + $0x1c0] sm:$0xff] %v580_v59  ;;  %v582_v3 = vmul.f32 1.7159, %v1057_v62  ;;  %1070 = vtanh.f32 %v333_v52  ;;  %v219_v33 = vld [vmem:[%s1400_s24 + $0x278] sm:$0xff]  ;;  %v345_v36 = vmul.f32 0.6666667, %v217_v25 }
  0x6e   : > { %v1061_v6 = vpop.eup %1060  ;;  %709 = vst [vmem:[%s1424_s17 + $0x1c8] sm:$0xff] %v581_v63  ;;  %v583_v7 = vmul.f32 1.7159, %v1059_v2  ;;  %1072 = vtanh.f32 %v334_v56  ;;  %v220_v37 = vld [vmem:[%s1400_s24 + $0x280] sm:$0xff]  ;;  %v346_v40 = vmul.f32 0.6666667, %v218_v29 }
  0x6f   : > { %v1063_v10 = vpop.eup %1062  ;;  %710 = vst [vmem:[%s1424_s17 + $0x1d0] sm:$0xff] %v582_v3  ;;  %v584_v11 = vmul.f32 1.7159, %v1061_v6  ;;  %1074 = vtanh.f32 %v335_v60  ;;  %v221_v41 = vld [vmem:[%s1400_s24 + $0x288] sm:$0xff]  ;;  %v347_v44 = vmul.f32 0.6666667, %v219_v33 }
  0x70   : > { %v1065_v14 = vpop.eup %1064  ;;  %711 = vst [vmem:[%s1424_s17 + $0x1d8] sm:$0xff] %v583_v7  ;;  %v585_v15 = vmul.f32 1.7159, %v1063_v10  ;;  %1076 = vtanh.f32 %v336_v0  ;;  %v222_v45 = vld [vmem:[%s1400_s24 + $0x290] sm:$0xff]  ;;  %v348_v48 = vmul.f32 0.6666667, %v220_v37 }
  0x71   : > { %v1067_v18 = vpop.eup %1066  ;;  %712 = vst [vmem:[%s1424_s17 + $0x1e0] sm:$0xff] %v584_v11  ;;  %v586_v19 = vmul.f32 1.7159, %v1065_v14  ;;  %1078 = vtanh.f32 %v337_v4  ;;  %v223_v49 = vld [vmem:[%s1400_s24 + $0x298] sm:$0xff]  ;;  %v349_v52 = vmul.f32 0.6666667, %v221_v41 }
  0x72   : > { %v1069_v22 = vpop.eup %1068  ;;  %713 = vst [vmem:[%s1424_s17 + $0x1e8] sm:$0xff] %v585_v15  ;;  %v587_v23 = vmul.f32 1.7159, %v1067_v18  ;;  %1080 = vtanh.f32 %v338_v8  ;;  %v224_v53 = vld [vmem:[%s1400_s24 + $0x2a0] sm:$0xff]  ;;  %v350_v56 = vmul.f32 0.6666667, %v222_v45 }
  0x73   : > { %v1071_v26 = vpop.eup %1070  ;;  %714 = vst [vmem:[%s1424_s17 + $0x1f0] sm:$0xff] %v586_v19  ;;  %v588_v27 = vmul.f32 1.7159, %v1069_v22  ;;  %1082 = vtanh.f32 %v339_v12  ;;  %v225_v57 = vld [vmem:[%s1400_s24 + $0x2a8] sm:$0xff]  ;;  %v351_v60 = vmul.f32 0.6666667, %v223_v49 }
  0x74   : > { %v1073_v30 = vpop.eup %1072  ;;  %715 = vst [vmem:[%s1424_s17 + $0x1f8] sm:$0xff] %v587_v23  ;;  %v589_v31 = vmul.f32 1.7159, %v1071_v26  ;;  %1084 = vtanh.f32 %v340_v16  ;;  %v226_v61 = vld [vmem:[%s1400_s24 + $0x2b0] sm:$0xff]  ;;  %v352_v0 = vmul.f32 0.6666667, %v224_v53 }
  0x75   : > { %v1075_v34 = vpop.eup %1074  ;;  %716 = vst [vmem:[%s1424_s17 + $0x200] sm:$0xff] %v588_v27  ;;  %v590_v35 = vmul.f32 1.7159, %v1073_v30  ;;  %1086 = vtanh.f32 %v341_v20  ;;  %v227_v1 = vld [vmem:[%s1400_s24 + $0x2b8] sm:$0xff]  ;;  %v353_v4 = vmul.f32 0.6666667, %v225_v57 }
  0x76   : > { %v1077_v38 = vpop.eup %1076  ;;  %717 = vst [vmem:[%s1424_s17 + $0x208] sm:$0xff] %v589_v31  ;;  %v591_v39 = vmul.f32 1.7159, %v1075_v34  ;;  %1088 = vtanh.f32 %v342_v24  ;;  %v228_v5 = vld [vmem:[%s1400_s24 + $0x2c0] sm:$0xff]  ;;  %v354_v8 = vmul.f32 0.6666667, %v226_v61 }
  0x77   : > { %v1079_v42 = vpop.eup %1078  ;;  %718 = vst [vmem:[%s1424_s17 + $0x210] sm:$0xff] %v590_v35  ;;  %v592_v43 = vmul.f32 1.7159, %v1077_v38  ;;  %1090 = vtanh.f32 %v343_v28  ;;  %v229_v9 = vld [vmem:[%s1400_s24 + $0x2c8] sm:$0xff]  ;;  %v355_v12 = vmul.f32 0.6666667, %v227_v1 }
  0x78   : > { %v1081_v46 = vpop.eup %1080  ;;  %719 = vst [vmem:[%s1424_s17 + $0x218] sm:$0xff] %v591_v39  ;;  %v593_v47 = vmul.f32 1.7159, %v1079_v42  ;;  %1092 = vtanh.f32 %v344_v32  ;;  %v230_v13 = vld [vmem:[%s1400_s24 + $0x2d0] sm:$0xff]  ;;  %v356_v16 = vmul.f32 0.6666667, %v228_v5 }
  0x79   : > { %v1083_v50 = vpop.eup %1082  ;;  %720 = vst [vmem:[%s1424_s17 + $0x220] sm:$0xff] %v592_v43  ;;  %v594_v51 = vmul.f32 1.7159, %v1081_v46  ;;  %1094 = vtanh.f32 %v345_v36  ;;  %v231_v17 = vld [vmem:[%s1400_s24 + $0x2d8] sm:$0xff]  ;;  %v357_v20 = vmul.f32 0.6666667, %v229_v9 }
  0x7a   : > { %v1085_v54 = vpop.eup %1084  ;;  %721 = vst [vmem:[%s1424_s17 + $0x228] sm:$0xff] %v593_v47  ;;  %v595_v55 = vmul.f32 1.7159, %v1083_v50  ;;  %1096 = vtanh.f32 %v346_v40  ;;  %v232_v21 = vld [vmem:[%s1400_s24 + $0x2e0] sm:$0xff]  ;;  %v358_v24 = vmul.f32 0.6666667, %v230_v13 }
  0x7b   : > { %v1087_v58 = vpop.eup %1086  ;;  %722 = vst [vmem:[%s1424_s17 + $0x230] sm:$0xff] %v594_v51  ;;  %v596_v59 = vmul.f32 1.7159, %v1085_v54  ;;  %1098 = vtanh.f32 %v347_v44  ;;  %v233_v25 = vld [vmem:[%s1400_s24 + $0x2e8] sm:$0xff]  ;;  %v359_v28 = vmul.f32 0.6666667, %v231_v17 }
  0x7c   : > { %v1089_v62 = vpop.eup %1088  ;;  %723 = vst [vmem:[%s1424_s17 + $0x238] sm:$0xff] %v595_v55  ;;  %v597_v63 = vmul.f32 1.7159, %v1087_v58  ;;  %1100 = vtanh.f32 %v348_v48  ;;  %v234_v29 = vld [vmem:[%s1400_s24 + $0x2f0] sm:$0xff]  ;;  %v360_v32 = vmul.f32 0.6666667, %v232_v21 }
  0x7d   : > { %v1091_v2 = vpop.eup %1090  ;;  %724 = vst [vmem:[%s1424_s17 + $0x240] sm:$0xff] %v596_v59  ;;  %v598_v3 = vmul.f32 1.7159, %v1089_v62  ;;  %1102 = vtanh.f32 %v349_v52  ;;  %v235_v33 = vld [vmem:[%s1400_s24 + $0x2f8] sm:$0xff]  ;;  %v361_v36 = vmul.f32 0.6666667, %v233_v25 }
  0x7e   : > { %v1093_v6 = vpop.eup %1092  ;;  %725 = vst [vmem:[%s1424_s17 + $0x248] sm:$0xff] %v597_v63  ;;  %v599_v7 = vmul.f32 1.7159, %v1091_v2  ;;  %1104 = vtanh.f32 %v350_v56  ;;  %v236_v37 = vld [vmem:[%s1400_s24 + $0x300] sm:$0xff]  ;;  %v362_v40 = vmul.f32 0.6666667, %v234_v29 }
  0x7f   : > { %v1095_v10 = vpop.eup %1094  ;;  %726 = vst [vmem:[%s1424_s17 + $0x250] sm:$0xff] %v598_v3  ;;  %v600_v11 = vmul.f32 1.7159, %v1093_v6  ;;  %1106 = vtanh.f32 %v351_v60  ;;  %v237_v41 = vld [vmem:[%s1400_s24 + $0x308] sm:$0xff]  ;;  %v363_v44 = vmul.f32 0.6666667, %v235_v33 }
  0x80   : > { %v1097_v14 = vpop.eup %1096  ;;  %727 = vst [vmem:[%s1424_s17 + $0x258] sm:$0xff] %v599_v7  ;;  %v601_v15 = vmul.f32 1.7159, %v1095_v10  ;;  %1108 = vtanh.f32 %v352_v0  ;;  %v238_v45 = vld [vmem:[%s1400_s24 + $0x310] sm:$0xff]  ;;  %v364_v48 = vmul.f32 0.6666667, %v236_v37 }
  0x81   : > { %v1099_v18 = vpop.eup %1098  ;;  %728 = vst [vmem:[%s1424_s17 + $0x260] sm:$0xff] %v600_v11  ;;  %v602_v19 = vmul.f32 1.7159, %v1097_v14  ;;  %1110 = vtanh.f32 %v353_v4  ;;  %v239_v49 = vld [vmem:[%s1400_s24 + $0x318] sm:$0xff]  ;;  %v365_v52 = vmul.f32 0.6666667, %v237_v41 }
  0x82   : > { %v1101_v22 = vpop.eup %1100  ;;  %729 = vst [vmem:[%s1424_s17 + $0x268] sm:$0xff] %v601_v15  ;;  %v603_v23 = vmul.f32 1.7159, %v1099_v18  ;;  %1112 = vtanh.f32 %v354_v8  ;;  %v240_v53 = vld [vmem:[%s1400_s24 + $0x320] sm:$0xff]  ;;  %v366_v56 = vmul.f32 0.6666667, %v238_v45 }
  0x83   : > { %v1103_v26 = vpop.eup %1102  ;;  %730 = vst [vmem:[%s1424_s17 + $0x270] sm:$0xff] %v602_v19  ;;  %v604_v27 = vmul.f32 1.7159, %v1101_v22  ;;  %1114 = vtanh.f32 %v355_v12  ;;  %v241_v57 = vld [vmem:[%s1400_s24 + $0x328] sm:$0xff]  ;;  %v367_v60 = vmul.f32 0.6666667, %v239_v49 }
  0x84   : > { %v1105_v30 = vpop.eup %1104  ;;  %731 = vst [vmem:[%s1424_s17 + $0x278] sm:$0xff] %v603_v23  ;;  %v605_v31 = vmul.f32 1.7159, %v1103_v26  ;;  %1116 = vtanh.f32 %v356_v16  ;;  %v242_v61 = vld [vmem:[%s1400_s24 + $0x330] sm:$0xff]  ;;  %v368_v0 = vmul.f32 0.6666667, %v240_v53 }
  0x85   : > { %v1107_v34 = vpop.eup %1106  ;;  %732 = vst [vmem:[%s1424_s17 + $0x280] sm:$0xff] %v604_v27  ;;  %v606_v35 = vmul.f32 1.7159, %v1105_v30  ;;  %1118 = vtanh.f32 %v357_v20  ;;  %v243_v1 = vld [vmem:[%s1400_s24 + $0x338] sm:$0xff]  ;;  %v369_v4 = vmul.f32 0.6666667, %v241_v57 }
  0x86   : > { %v1109_v38 = vpop.eup %1108  ;;  %733 = vst [vmem:[%s1424_s17 + $0x288] sm:$0xff] %v605_v31  ;;  %v607_v39 = vmul.f32 1.7159, %v1107_v34  ;;  %1120 = vtanh.f32 %v358_v24  ;;  %v244_v5 = vld [vmem:[%s1400_s24 + $0x340] sm:$0xff]  ;;  %v370_v8 = vmul.f32 0.6666667, %v242_v61 }
  0x87   : > { %v1111_v42 = vpop.eup %1110  ;;  %734 = vst [vmem:[%s1424_s17 + $0x290] sm:$0xff] %v606_v35  ;;  %v608_v43 = vmul.f32 1.7159, %v1109_v38  ;;  %1122 = vtanh.f32 %v359_v28  ;;  %v245_v9 = vld [vmem:[%s1400_s24 + $0x348] sm:$0xff]  ;;  %v371_v12 = vmul.f32 0.6666667, %v243_v1 }
  0x88   : > { %v1113_v46 = vpop.eup %1112  ;;  %735 = vst [vmem:[%s1424_s17 + $0x298] sm:$0xff] %v607_v39  ;;  %v609_v47 = vmul.f32 1.7159, %v1111_v42  ;;  %1124 = vtanh.f32 %v360_v32  ;;  %v246_v13 = vld [vmem:[%s1400_s24 + $0x350] sm:$0xff]  ;;  %v372_v16 = vmul.f32 0.6666667, %v244_v5 }
  0x89   : > { %v1115_v50 = vpop.eup %1114  ;;  %736 = vst [vmem:[%s1424_s17 + $0x2a0] sm:$0xff] %v608_v43  ;;  %v610_v51 = vmul.f32 1.7159, %v1113_v46  ;;  %1126 = vtanh.f32 %v361_v36  ;;  %v247_v17 = vld [vmem:[%s1400_s24 + $0x358] sm:$0xff]  ;;  %v373_v20 = vmul.f32 0.6666667, %v245_v9 }
  0x8a   : > { %v1117_v54 = vpop.eup %1116  ;;  %737 = vst [vmem:[%s1424_s17 + $0x2a8] sm:$0xff] %v609_v47  ;;  %v611_v55 = vmul.f32 1.7159, %v1115_v50  ;;  %1128 = vtanh.f32 %v362_v40  ;;  %v248_v21 = vld [vmem:[%s1400_s24 + $0x360] sm:$0xff]  ;;  %v374_v24 = vmul.f32 0.6666667, %v246_v13 }
  0x8b   : > { %v1119_v58 = vpop.eup %1118  ;;  %738 = vst [vmem:[%s1424_s17 + $0x2b0] sm:$0xff] %v610_v51  ;;  %v612_v59 = vmul.f32 1.7159, %v1117_v54  ;;  %1130 = vtanh.f32 %v363_v44  ;;  %v249_v25 = vld [vmem:[%s1400_s24 + $0x368] sm:$0xff]  ;;  %v375_v28 = vmul.f32 0.6666667, %v247_v17 }
  0x8c   : > { %v1121_v62 = vpop.eup %1120  ;;  %739 = vst [vmem:[%s1424_s17 + $0x2b8] sm:$0xff] %v611_v55  ;;  %v613_v63 = vmul.f32 1.7159, %v1119_v58  ;;  %1132 = vtanh.f32 %v364_v48  ;;  %v250_v29 = vld [vmem:[%s1400_s24 + $0x370] sm:$0xff]  ;;  %v376_v32 = vmul.f32 0.6666667, %v248_v21 }
  0x8d   : > { %v1123_v2 = vpop.eup %1122  ;;  %740 = vst [vmem:[%s1424_s17 + $0x2c0] sm:$0xff] %v612_v59  ;;  %v614_v3 = vmul.f32 1.7159, %v1121_v62  ;;  %1134 = vtanh.f32 %v365_v52  ;;  %v251_v33 = vld [vmem:[%s1400_s24 + $0x378] sm:$0xff]  ;;  %v377_v36 = vmul.f32 0.6666667, %v249_v25 }
  0x8e   : > { %v1125_v6 = vpop.eup %1124  ;;  %741 = vst [vmem:[%s1424_s17 + $0x2c8] sm:$0xff] %v613_v63  ;;  %v615_v7 = vmul.f32 1.7159, %v1123_v2  ;;  %1136 = vtanh.f32 %v366_v56  ;;  %v252_v37 = vld [vmem:[%s1400_s24 + $0x380] sm:$0xff]  ;;  %v378_v40 = vmul.f32 0.6666667, %v250_v29 }
  0x8f   : > { %v1127_v10 = vpop.eup %1126  ;;  %742 = vst [vmem:[%s1424_s17 + $0x2d0] sm:$0xff] %v614_v3  ;;  %v616_v11 = vmul.f32 1.7159, %v1125_v6  ;;  %1138 = vtanh.f32 %v367_v60  ;;  %v253_v41 = vld [vmem:[%s1400_s24 + $0x388] sm:$0xff]  ;;  %v379_v44 = vmul.f32 0.6666667, %v251_v33 }
  0x90   : > { %v1129_v14 = vpop.eup %1128  ;;  %743 = vst [vmem:[%s1424_s17 + $0x2d8] sm:$0xff] %v615_v7  ;;  %v617_v15 = vmul.f32 1.7159, %v1127_v10  ;;  %1140 = vtanh.f32 %v368_v0  ;;  %v254_v45 = vld [vmem:[%s1400_s24 + $0x390] sm:$0xff]  ;;  %v380_v48 = vmul.f32 0.6666667, %v252_v37 }
  0x91   : > { %v1131_v18 = vpop.eup %1130  ;;  %744 = vst [vmem:[%s1424_s17 + $0x2e0] sm:$0xff] %v616_v11  ;;  %v618_v19 = vmul.f32 1.7159, %v1129_v14  ;;  %1142 = vtanh.f32 %v369_v4  ;;  %v255_v49 = vld [vmem:[%s1400_s24 + $0x398] sm:$0xff]  ;;  %v381_v52 = vmul.f32 0.6666667, %v253_v41 }
  0x92   : > { %v1133_v22 = vpop.eup %1132  ;;  %745 = vst [vmem:[%s1424_s17 + $0x2e8] sm:$0xff] %v617_v15  ;;  %v619_v23 = vmul.f32 1.7159, %v1131_v18  ;;  %1144 = vtanh.f32 %v370_v8  ;;  %v256_v53 = vld [vmem:[%s1400_s24 + $0x3a0] sm:$0xff]  ;;  %v382_v56 = vmul.f32 0.6666667, %v254_v45 }
  0x93   : > { %v1135_v26 = vpop.eup %1134  ;;  %746 = vst [vmem:[%s1424_s17 + $0x2f0] sm:$0xff] %v618_v19  ;;  %v620_v27 = vmul.f32 1.7159, %v1133_v22  ;;  %1146 = vtanh.f32 %v371_v12  ;;  %v257_v57 = vld [vmem:[%s1400_s24 + $0x3a8] sm:$0xff]  ;;  %v383_v60 = vmul.f32 0.6666667, %v255_v49 }
  0x94   : > { %v1137_v30 = vpop.eup %1136  ;;  %747 = vst [vmem:[%s1424_s17 + $0x2f8] sm:$0xff] %v619_v23  ;;  %v621_v31 = vmul.f32 1.7159, %v1135_v26  ;;  %1148 = vtanh.f32 %v372_v16  ;;  %v258_v61 = vld [vmem:[%s1400_s24 + $0x3b0] sm:$0xff]  ;;  %v384_v0 = vmul.f32 0.6666667, %v256_v53 }
  0x95   : > { %v1139_v34 = vpop.eup %1138  ;;  %748 = vst [vmem:[%s1424_s17 + $0x300] sm:$0xff] %v620_v27  ;;  %v622_v35 = vmul.f32 1.7159, %v1137_v30  ;;  %1150 = vtanh.f32 %v373_v20  ;;  %v259_v1 = vld [vmem:[%s1400_s24 + $0x3b8] sm:$0xff]  ;;  %v385_v4 = vmul.f32 0.6666667, %v257_v57 }
  0x96   : > { %v1141_v38 = vpop.eup %1140  ;;  %749 = vst [vmem:[%s1424_s17 + $0x308] sm:$0xff] %v621_v31  ;;  %v623_v39 = vmul.f32 1.7159, %v1139_v34  ;;  %1152 = vtanh.f32 %v374_v24  ;;  %v260_v5 = vld [vmem:[%s1400_s24 + $0x3c0] sm:$0xff]  ;;  %v386_v8 = vmul.f32 0.6666667, %v258_v61 }
  0x97   : > { %v1143_v42 = vpop.eup %1142  ;;  %750 = vst [vmem:[%s1424_s17 + $0x310] sm:$0xff] %v622_v35  ;;  %v624_v43 = vmul.f32 1.7159, %v1141_v38  ;;  %1154 = vtanh.f32 %v375_v28  ;;  %v261_v9 = vld [vmem:[%s1400_s24 + $0x3c8] sm:$0xff]  ;;  %v387_v12 = vmul.f32 0.6666667, %v259_v1 }
  0x98   : > { %v1145_v46 = vpop.eup %1144  ;;  %751 = vst [vmem:[%s1424_s17 + $0x318] sm:$0xff] %v623_v39  ;;  %v625_v47 = vmul.f32 1.7159, %v1143_v42  ;;  %1156 = vtanh.f32 %v376_v32  ;;  %v262_v13 = vld [vmem:[%s1400_s24 + $0x3d0] sm:$0xff]  ;;  %v388_v16 = vmul.f32 0.6666667, %v260_v5 }
  0x99   : > { %v1147_v50 = vpop.eup %1146  ;;  %752 = vst [vmem:[%s1424_s17 + $0x320] sm:$0xff] %v624_v43  ;;  %v626_v51 = vmul.f32 1.7159, %v1145_v46  ;;  %1158 = vtanh.f32 %v377_v36  ;;  %v263_v17 = vld [vmem:[%s1400_s24 + $0x3d8] sm:$0xff]  ;;  %v389_v20 = vmul.f32 0.6666667, %v261_v9 }
  0x9a   : > { %v1149_v54 = vpop.eup %1148  ;;  %753 = vst [vmem:[%s1424_s17 + $0x328] sm:$0xff] %v625_v47  ;;  %v627_v55 = vmul.f32 1.7159, %v1147_v50  ;;  %1160 = vtanh.f32 %v378_v40  ;;  %v264_v21 = vld [vmem:[%s1400_s24 + $0x3e0] sm:$0xff]  ;;  %v390_v24 = vmul.f32 0.6666667, %v262_v13 }
  0x9b   : > { %v1151_v58 = vpop.eup %1150  ;;  %754 = vst [vmem:[%s1424_s17 + $0x330] sm:$0xff] %v626_v51  ;;  %v628_v59 = vmul.f32 1.7159, %v1149_v54  ;;  %1162 = vtanh.f32 %v379_v44  ;;  %v265_v25 = vld [vmem:[%s1400_s24 + $0x3e8] sm:$0xff]  ;;  %v391_v28 = vmul.f32 0.6666667, %v263_v17 }
  0x9c   : > { %v1153_v62 = vpop.eup %1152  ;;  %755 = vst [vmem:[%s1424_s17 + $0x338] sm:$0xff] %v627_v55  ;;  %v629_v63 = vmul.f32 1.7159, %v1151_v58  ;;  %1164 = vtanh.f32 %v380_v48  ;;  %v266_v29 = vld [vmem:[%s1400_s24 + $0x3f0] sm:$0xff]  ;;  %v392_v32 = vmul.f32 0.6666667, %v264_v21 }
  0x9d   : > { %v1155_v2 = vpop.eup %1154  ;;  %756 = vst [vmem:[%s1424_s17 + $0x340] sm:$0xff] %v628_v59  ;;  %v630_v3 = vmul.f32 1.7159, %v1153_v62  ;;  %1166 = vtanh.f32 %v381_v52  ;;  %v267_v33 = vld [vmem:[%s1400_s24 + $0x3f8] sm:$0xff]  ;;  %v393_v36 = vmul.f32 0.6666667, %v265_v25 }
  0x9e   : > { %v1157_v6 = vpop.eup %1156  ;;  %757 = vst [vmem:[%s1424_s17 + $0x348] sm:$0xff] %v629_v63  ;;  %v631_v7 = vmul.f32 1.7159, %v1155_v2  ;;  %1168 = vtanh.f32 %v382_v56  ;;  %v394_v39 = vmul.f32 0.6666667, %v266_v29  ;;  %s794_s28 = sshll.u32 %s1424_s17, 4  ;;  %s795_s28 = int_to_ptr.vmem [resolvable:$true] %s794_s28 }
  0x9f   : > { %v1159_v10 = vpop.eup %1158  ;;  %758 = vst [vmem:[%s1424_s17 + $0x350] sm:$0xff] %v630_v3  ;;  %v632_v11 = vmul.f32 1.7159, %v1157_v6  ;;  %1170 = vtanh.f32 %v383_v60  ;;  %v395_v42 = vmul.f32 0.6666667, %v267_v33  ;;  %s796_s29 = sshll.u32 %s793_s10, 4  ;;  %s797_s29 = int_to_ptr.hbm [resolvable:$true] %s796_s29 }
  0xa0   : > { %v1161_v14 = vpop.eup %1160  ;;  %759 = vst [vmem:[%s1424_s17 + $0x358] sm:$0xff] %v631_v7  ;;  %v633_v15 = vmul.f32 1.7159, %v1159_v10  ;;  %1172 = vtanh.f32 %v384_v0  ;;  %s781_s30 = scalar_lea.sflag [#allocation4], %s1394_s21  ;;  %s1240_s2 = sshra.s32 %s797_s29, 4  ;;  %s1241_s2 = int_to_ptr.hbm [resolvable:$true] %s1240_s2 }
  0xa1   : > { %v1163_v18 = vpop.eup %1162  ;;  %760 = vst [vmem:[%s1424_s17 + $0x360] sm:$0xff] %v632_v11  ;;  %v634_v19 = vmul.f32 1.7159, %v1161_v14  ;;  %1174 = vtanh.f32 %v385_v4  ;;  %s1242_s3 = scalar_lea.hbm %s1241_s2, 1024  ;;  %s1246_s11 = scalar_lea.hbm %s1701_s1, 2048 }
  0xa2   : > { %v1165_v22 = vpop.eup %1164  ;;  %761 = vst [vmem:[%s1424_s17 + $0x368] sm:$0xff] %v633_v15  ;;  %v635_v23 = vmul.f32 1.7159, %v1163_v18  ;;  %1176 = vtanh.f32 %v386_v8  ;;  %p1243_p6 = scmp.ne.s32.totalorder %s1241_s2, %s1242_s3  ;;  %p1247_p0 = scmp.lt.s32.totalorder %s1241_s2, %s1701_s1 }
  0xa3   : > { %v1167_v26 = vpop.eup %1166  ;;  %762 = vst [vmem:[%s1424_s17 + $0x370] sm:$0xff] %v634_v19  ;;  %v636_v27 = vmul.f32 1.7159, %v1165_v22  ;;  %1178 = vtanh.f32 %v387_v12  ;;  %p1248_p1 = scmp.lt.s32.totalorder %s1246_s11, %s1242_s3 }
  0xa4   : > { %v1169_v30 = vpop.eup %1168  ;;  %763 = vst [vmem:[%s1424_s17 + $0x378] sm:$0xff] %v635_v23  ;;  %v637_v31 = vmul.f32 1.7159, %v1167_v26  ;;  %1180 = vtanh.f32 %v388_v16  ;;  %p1244_p9 = pnand %p1243_p6, %p1358_p11 }
  0xa5   : > { %v1171_v34 = vpop.eup %1170  ;;  %764 = vst [vmem:[%s1424_s17 + $0x380] sm:$0xff] %v636_v27  ;;  %v638_v35 = vmul.f32 1.7159, %v1169_v30  ;;  %1182 = vtanh.f32 %v389_v20  ;;  %p1249_p3 = por %p1248_p1, %p1247_p0 }
  0xa6   : > { %v1173_v37 = vpop.eup %1172  ;;  %765 = vst [vmem:[%s1424_s17 + $0x388] sm:$0xff] %v637_v31  ;;  %v639_v38 = vmul.f32 1.7159, %v1171_v34  ;;  %1184 = vtanh.f32 %v390_v24  ;;  %p1245_p13 = pneg %p1244_p9 }
  0xa7   : > { %v1175_v40 = vpop.eup %1174  ;;  %766 = vst [vmem:[%s1424_s17 + $0x390] sm:$0xff] %v638_v35  ;;  %v640_v41 = vmul.f32 1.7159, %v1173_v37  ;;  %1186 = vtanh.f32 %v391_v28 }
  0xa8   : > { %v1177_v43 = vpop.eup %1176  ;;  %767 = vst [vmem:[%s1424_s17 + $0x398] sm:$0xff] %v639_v38  ;;  %v641_v44 = vmul.f32 1.7159, %v1175_v40  ;;  %1188 = vtanh.f32 %v392_v32  ;;  %p1250_p4 = pnand %p1249_p3, %p1245_p13 }
  0xa9   : > { %v1179_v45 = vpop.eup %1178  ;;  %768 = vst [vmem:[%s1424_s17 + $0x3a0] sm:$0xff] %v640_v41  ;;  %v642_v46 = vmul.f32 1.7159, %v1177_v43  ;;  %1190 = vtanh.f32 %v393_v36 }
  0xaa   : > { %v1181_v47 = vpop.eup %1180  ;;  %769 = vst [vmem:[%s1424_s17 + $0x3a8] sm:$0xff] %v641_v44  ;;  %v643_v48 = vmul.f32 1.7159, %v1179_v45  ;;  %1192 = vtanh.f32 %v394_v39 }
  0xab   : > { %v1183_v49 = vpop.eup %1182  ;;  %770 = vst [vmem:[%s1424_s17 + $0x3b0] sm:$0xff] %v642_v46  ;;  %v644_v50 = vmul.f32 1.7159, %v1181_v47  ;;  %1194 = vtanh.f32 %v395_v42 }
  0xac   : > { %v1185_v51 = vpop.eup %1184  ;;  %771 = vst [vmem:[%s1424_s17 + $0x3b8] sm:$0xff] %v643_v48  ;;  %v645_v52 = vmul.f32 1.7159, %v1183_v49 }
  0xad   : > { %v1187_v53 = vpop.eup %1186  ;;  %772 = vst [vmem:[%s1424_s17 + $0x3c0] sm:$0xff] %v644_v50  ;;  %v646_v54 = vmul.f32 1.7159, %v1185_v51 }
  0xae   : > { %v1189_v55 = vpop.eup %1188  ;;  %773 = vst [vmem:[%s1424_s17 + $0x3c8] sm:$0xff] %v645_v52  ;;  %v647_v56 = vmul.f32 1.7159, %v1187_v53 }
  0xaf   : > { %v1191_v57 = vpop.eup %1190  ;;  %774 = vst [vmem:[%s1424_s17 + $0x3d0] sm:$0xff] %v646_v54  ;;  %v648_v58 = vmul.f32 1.7159, %v1189_v55 }
  0xb0   : > { %v1193_v59 = vpop.eup %1192  ;;  %775 = vst [vmem:[%s1424_s17 + $0x3d8] sm:$0xff] %v647_v56  ;;  %v649_v60 = vmul.f32 1.7159, %v1191_v57 }
  0xb1   : > { %v1195_v61 = vpop.eup %1194  ;;  %776 = vst [vmem:[%s1424_s17 + $0x3e0] sm:$0xff] %v648_v58  ;;  %v650_v62 = vmul.f32 1.7159, %v1193_v59 }
  0xb2   : > { %777 = vst [vmem:[%s1424_s17 + $0x3e8] sm:$0xff] %v649_v60  ;;  %v651_v63 = vmul.f32 1.7159, %v1195_v61 }
  0xb3   : > { %778 = vst [vmem:[%s1424_s17 + $0x3f0] sm:$0xff] %v650_v62 }
  0xb4   : > { %779 = vst [vmem:[%s1424_s17 + $0x3f8] sm:$0xff] %v651_v63 }
  0xb5   : > { %1253 = shalt.err (!%p1250_p4)
}
  0xb6   : > { %s1296_s16 = smov 4096   ;;  %s1297_s20 = smov 256  }
  0xb7   : > { %892 = dma.vmem_to_hbm [thread:$0]  (%p1358_p11), %s795_s28, 16384, %s797_s29, %s781_s30, %s1296_s16, %s1296_s16, %s1297_s20  }
  0xb8 PF: > { %s811_s21 = sand.u32 1, %s1280_s6   ;;  %p1707_p7 = scmp.ge.s32.totalorder %s1292_s9, 2 }
  0xb9   : > { %s812_s22 = scalar_lea.sflag [#allocation4], %s811_s21 }
  0xba   : > { %p899_p5 = pnand %p1707_p7, %p1362_p12 }
  0xbc   : > { %p900_p8 = pneg %p899_p5 }
  0xbe   : > { %1275 = dma.done.wait (%p900_p8), %s812_s22, 16384  }
  0xbf   : > { %1277 = vsyncadd (%p900_p8), %s812_s22, 4294950912  ;;  %p14_p10 = scmp.ge.s32.totalorder %s1333_s12, 4   ;;  %s1708_s6 = smov %s1284_s7 }
  0xc0   : > { %s1709_s7 = smov %s1288_s8  ;;  %s1710_s8 = smov %s1345_s15 }
  0xc1   : > { %s1711_s9 = smov %s1333_s12  ;;  %16 = sbr.rel (!%p14_p10) target bundleno = 5 (0x5), region = 69 }
  0xc6   :  { %818 = vsyncpa [#allocation3], 1 }
  0xc7   :  { %820 = vsyncpa [#allocation3 + $0x1], 1 }
  0xc8   :  { %821 = vsyncpa [#allocation4], 1 }
  0xc9   :  { %823 = vsyncpa [#allocation4 + $0x1], 1 }

</bundles_post_ra>
